<compile_context>
chip_gen: v5e
topology: v5e:2x2
jax: 0.10.0
libtpu: 0.0.40
codegen_flags: <defaults>
</compile_context>

<pallas_src>
import functools

import jax
import jax.numpy as jnp
from jax.experimental import pallas as pl
from jax.experimental.pallas import tpu as pltpu


def _round_up(x, m):
    return ((x + m - 1) // m) * m


def _mlp_kernel(n_hidden, *refs):
    """refs = (x, W1, b1, ..., Wn, bn, W_act, b_act, out).

    x / W_* are bf16 (MXU-native), biases are f32, accumulation / epilogue
    (bias add + tanh) are f32, hidden activations re-cast to bf16 for the
    next MXU dot.
    """
    x_ref = refs[0]
    out_ref = refs[-1]

    h = x_ref[...]                               # bf16 [TB, obs_dim]
    idx = 1
    for _ in range(n_hidden):
        w_ref, b_ref = refs[idx], refs[idx + 1]
        idx += 2
        z = jnp.dot(h, w_ref[...], preferred_element_type=jnp.float32)
        z = z + b_ref[...]                       # f32 bias add
        h = jnp.tanh(z).astype(jnp.bfloat16)     # f32 tanh (EUP), bf16 for next dot
    w_ref, b_ref = refs[idx], refs[idx + 1]
    out_ref[...] = (
        jnp.dot(h, w_ref[...], preferred_element_type=jnp.float32) + b_ref[...]
    ).astype(out_ref.dtype)                      # lane-dense (padded) f32 store


def discrete_action_fc_forward(x, hidden_params, action_params, *, block_batch=256):
    """x: [B, obs_dim] f32; hidden_params: list of (W [in,out], b [1,out]);
    action_params: (W_act [in, sum(act_dims)], b_act [1, sum(act_dims)])."""
    n_hidden = len(hidden_params)
    w_act, b_act = action_params
    out_dim = w_act.shape[1]
    batch, obs_dim = x.shape

    # --- pad action head to a lane-dense width (multiple of 128) ------------
    padded_out = max(128, _round_up(out_dim, 128))
    if padded_out != out_dim:
        w_act = jnp.pad(w_act, ((0, 0), (0, padded_out - out_dim)))
        b_act = jnp.pad(b_act, ((0, 0), (0, padded_out - out_dim)))

    # --- bf16 MXU operands, f32 biases --------------------------------------
    x_bf = x.astype(jnp.bfloat16)
    flat_params = []
    for w, b in hidden_params:
        flat_params += [w.astype(jnp.bfloat16), b.astype(jnp.float32)]
    flat_params += [w_act.astype(jnp.bfloat16), b_act.astype(jnp.float32)]

    # --- batch tiling: pad batch to a multiple of the tile -------------------
    tb = min(block_batch, _round_up(batch, 8))
    tb = _round_up(tb, 8)
    padded_batch = _round_up(batch, tb)
    if padded_batch != batch:
        x_bf = jnp.pad(x_bf, ((0, padded_batch - batch), (0, 0)))

    grid = (padded_batch // tb,)

    x_spec = pl.BlockSpec((tb, obs_dim), lambda i: (i, 0))
    out_spec = pl.BlockSpec((tb, padded_out), lambda i: (i, 0))
    # Full-shape specs with a constant index_map: weights/biases are fetched
    # once and stay VMEM-resident across all batch tiles.
    param_specs = [pl.BlockSpec(tuple(p.shape), lambda i: (0, 0)) for p in flat_params]

    kernel = functools.partial(_mlp_kernel, n_hidden)

    out_padded = pl.pallas_call(
        kernel,
        out_shape=jax.ShapeDtypeStruct((padded_batch, padded_out), jnp.float32),
        grid=grid,
        in_specs=[x_spec] + param_specs,
        out_specs=out_spec,
        compiler_params=pltpu.CompilerParams(
            dimension_semantics=("parallel",),      # megacore sharding on v7x
            vmem_limit_bytes=32 * 1024 * 1024,      # safe on v5e/v6e/v7x
        ),
    )(x_bf, *flat_params)

    return out_padded[:batch, :out_dim]


def _reference(x, hidden_params, action_params):
    h = x.astype(jnp.float32)
    for w, b in hidden_params:
        h = jnp.tanh(h @ w + b)
    w, b = action_params
    return h @ w + b


if __name__ == "__main__":
    # Small, forward-consistent shapes.
    batch = 2
    obs_dim = 16
    hidden_sizes = [32, 32]
    act_dims = [3, 4, 5]          # final output dim = sum(act_dims) = 12
    out_dim = sum(act_dims)

    key = jax.random.PRNGKey(0)
    keys = jax.random.split(key, 2 * (len(hidden_sizes) + 1) + 2)

    # Deterministic synthetic parameters (not a checkpoint load).
    layer_sizes = (obs_dim,) + tuple(hidden_sizes)
    hidden_params = []
    ki = 0
    for i in range(len(layer_sizes) - 1):
        fan_in, fan_out = layer_sizes[i], layer_sizes[i + 1]
        w = jax.random.normal(keys[ki], (fan_in, fan_out), jnp.float32) * 0.1
        b = jax.random.normal(keys[ki + 1], (1, fan_out), jnp.float32) * 0.01
        hidden_params.append((w, b))
        ki += 2
    w_act = jax.random.normal(keys[ki], (layer_sizes[-1], out_dim), jnp.float32) * 0.1
    b_act = jax.random.normal(keys[ki + 1], (1, out_dim), jnp.float32) * 0.01
    action_params = (w_act, b_act)
    ki += 2

    x = jax.random.normal(keys[ki], (batch, obs_dim), jnp.float32)

    out = discrete_action_fc_forward(x, hidden_params, action_params)
    out = jax.block_until_ready(out)
    ref = _reference(x, hidden_params, action_params)
    assert out.shape == (batch, out_dim)
    # bf16 MXU operands -> loosened tolerance vs the f32 reference.
    assert jnp.allclose(out, ref, atol=3e-2, rtol=3e-2), (
        float(jnp.max(jnp.abs(out - ref))))

    # Exercise the batch grid / padding path (multiple tiles, non-multiple batch).
    x_big = jax.random.normal(keys[ki + 1], (300, obs_dim), jnp.float32)
    out_big = discrete_action_fc_forward(x_big, hidden_params, action_params)
    out_big = jax.block_until_ready(out_big)
    ref_big = _reference(x_big, hidden_params, action_params)
    assert out_big.shape == (300, out_dim)
    assert jnp.allclose(out_big, ref_big, atol=3e-2, rtol=3e-2), (
        float(jnp.max(jnp.abs(out_big - ref_big))))

    print("KERNEL_OK")
</pallas_src>

<mosaic_0001>
module attributes {stable_mosaic.version = 11 : i64} {
  func.func @_mlp_kernel(%arg0: i32, %arg1: memref<8x16xbf16, #tpu.memory_space<vmem>>, %arg2: memref<16x32xbf16, #tpu.memory_space<vmem>>, %arg3: memref<1x32xf32, #tpu.memory_space<vmem>>, %arg4: memref<32x32xbf16, #tpu.memory_space<vmem>>, %arg5: memref<1x32xf32, #tpu.memory_space<vmem>>, %arg6: memref<32x128xbf16, #tpu.memory_space<vmem>>, %arg7: memref<1x128xf32, #tpu.memory_space<vmem>>, %arg8: memref<8x128xf32, #tpu.memory_space<vmem>>) attributes {dimension_semantics = [#tpu.dimension_semantics<parallel>], iteration_bounds = array<i64: 1>, scalar_prefetch = 0 : i64, scratch_operands = 0 : i64, tpu.core_type = #tpu.core_type<tc>, window_params = [{transform_indices = @transform_0, window_bounds = array<i64: 8, 16>}, {pipeline_mode = #tpu.pipeline_mode<synchronous>, transform_indices = @transform_1, window_bounds = array<i64: 16, 32>}, {pipeline_mode = #tpu.pipeline_mode<synchronous>, transform_indices = @transform_2, window_bounds = array<i64: 1, 32>}, {pipeline_mode = #tpu.pipeline_mode<synchronous>, transform_indices = @transform_3, window_bounds = array<i64: 32, 32>}, {pipeline_mode = #tpu.pipeline_mode<synchronous>, transform_indices = @transform_4, window_bounds = array<i64: 1, 32>}, {pipeline_mode = #tpu.pipeline_mode<synchronous>, transform_indices = @transform_5, window_bounds = array<i64: 32, 128>}, {pipeline_mode = #tpu.pipeline_mode<synchronous>, transform_indices = @transform_6, window_bounds = array<i64: 1, 128>}, {transform_indices = @transform_7, window_bounds = array<i64: 8, 128>}]} {
    %c0 = arith.constant 0 : index
    %c0_0 = arith.constant 0 : index
    %0 = vector.load %arg1[%c0, %c0_0] : memref<8x16xbf16, #tpu.memory_space<vmem>>, vector<8x16xbf16>
    %c0_1 = arith.constant 0 : index
    %c0_2 = arith.constant 0 : index
    %1 = vector.load %arg2[%c0_1, %c0_2] : memref<16x32xbf16, #tpu.memory_space<vmem>>, vector<16x32xbf16>
    %cst = arith.constant dense<0.000000e+00> : vector<8x32xf32>
    %2 = tpu.matmul %0, %1, %cst {dimension_numbers = #tpu.dot_dimension_numbers<[1], [0], [0], [1], [0, 0, 1, 1], [], []>} : vector<8x16xbf16>, vector<16x32xbf16>, vector<8x32xf32> -> vector<8x32xf32>
    %c0_3 = arith.constant 0 : index
    %c0_4 = arith.constant 0 : index
    %3 = vector.load %arg3[%c0_3, %c0_4] : memref<1x32xf32, #tpu.memory_space<vmem>>, vector<1x32xf32>
    %4 = vector.broadcast %3 : vector<1x32xf32> to vector<8x32xf32>
    %5 = arith.addf %2, %4 : vector<8x32xf32>
    %6 = math.tanh %5 : vector<8x32xf32>
    %7 = arith.truncf %6 : vector<8x32xf32> to vector<8x32xbf16>
    %c0_5 = arith.constant 0 : index
    %c0_6 = arith.constant 0 : index
    %8 = vector.load %arg4[%c0_5, %c0_6] : memref<32x32xbf16, #tpu.memory_space<vmem>>, vector<32x32xbf16>
    %cst_7 = arith.constant dense<0.000000e+00> : vector<8x32xf32>
    %9 = tpu.matmul %7, %8, %cst_7 {dimension_numbers = #tpu.dot_dimension_numbers<[1], [0], [0], [1], [0, 0, 1, 1], [], []>} : vector<8x32xbf16>, vector<32x32xbf16>, vector<8x32xf32> -> vector<8x32xf32>
    %c0_8 = arith.constant 0 : index
    %c0_9 = arith.constant 0 : index
    %10 = vector.load %arg5[%c0_8, %c0_9] : memref<1x32xf32, #tpu.memory_space<vmem>>, vector<1x32xf32>
    %11 = vector.broadcast %10 : vector<1x32xf32> to vector<8x32xf32>
    %12 = arith.addf %9, %11 : vector<8x32xf32>
    %13 = math.tanh %12 : vector<8x32xf32>
    %14 = arith.truncf %13 : vector<8x32xf32> to vector<8x32xbf16>
    %c0_10 = arith.constant 0 : index
    %c0_11 = arith.constant 0 : index
    %15 = vector.load %arg6[%c0_10, %c0_11] : memref<32x128xbf16, #tpu.memory_space<vmem>>, vector<32x128xbf16>
    %cst_12 = arith.constant dense<0.000000e+00> : vector<8x128xf32>
    %16 = tpu.matmul %14, %15, %cst_12 {dimension_numbers = #tpu.dot_dimension_numbers<[1], [0], [0], [1], [0, 0, 1, 1], [], []>} : vector<8x32xbf16>, vector<32x128xbf16>, vector<8x128xf32> -> vector<8x128xf32>
    %c0_13 = arith.constant 0 : index
    %c0_14 = arith.constant 0 : index
    %17 = vector.load %arg7[%c0_13, %c0_14] : memref<1x128xf32, #tpu.memory_space<vmem>>, vector<1x128xf32>
    %18 = vector.broadcast %17 : vector<1x128xf32> to vector<8x128xf32>
    %19 = arith.addf %16, %18 : vector<8x128xf32>
    %c0_15 = arith.constant 0 : index
    %c0_16 = arith.constant 0 : index
    %20 = vector.load %arg8[%c0_15, %c0_16] : memref<8x128xf32, #tpu.memory_space<vmem>>, vector<8x128xf32>
    tpu.vector_store %arg8[%c0_15, %c0_16], %19 {strides = array<i32>} : memref<8x128xf32, #tpu.memory_space<vmem>>, vector<8x128xf32>,
    return
  }
  func.func @transform_0(%arg0: i32) -> (i32, i32) {
    %c0_i32 = arith.constant 0 : i32
    %c0_i32_0 = arith.constant 0 : i32
    return %arg0, %c0_i32 : i32, i32
  }
  func.func @transform_1(%arg0: i32) -> (i32, i32) {
    %c0_i32 = arith.constant 0 : i32
    %c0_i32_0 = arith.constant 0 : i32
    %c0_i32_1 = arith.constant 0 : i32
    return %c0_i32, %c0_i32_0 : i32, i32
  }
  func.func @transform_2(%arg0: i32) -> (i32, i32) {
    %c0_i32 = arith.constant 0 : i32
    %c0_i32_0 = arith.constant 0 : i32
    %c0_i32_1 = arith.constant 0 : i32
    return %c0_i32, %c0_i32_0 : i32, i32
  }
  func.func @transform_3(%arg0: i32) -> (i32, i32) {
    %c0_i32 = arith.constant 0 : i32
    %c0_i32_0 = arith.constant 0 : i32
    %c0_i32_1 = arith.constant 0 : i32
    return %c0_i32, %c0_i32_0 : i32, i32
  }
  func.func @transform_4(%arg0: i32) -> (i32, i32) {
    %c0_i32 = arith.constant 0 : i32
    %c0_i32_0 = arith.constant 0 : i32
    %c0_i32_1 = arith.constant 0 : i32
    return %c0_i32, %c0_i32_0 : i32, i32
  }
  func.func @transform_5(%arg0: i32) -> (i32, i32) {
    %c0_i32 = arith.constant 0 : i32
    %c0_i32_0 = arith.constant 0 : i32
    %c0_i32_1 = arith.constant 0 : i32
    return %c0_i32, %c0_i32_0 : i32, i32
  }
  func.func @transform_6(%arg0: i32) -> (i32, i32) {
    %c0_i32 = arith.constant 0 : i32
    %c0_i32_0 = arith.constant 0 : i32
    %c0_i32_1 = arith.constant 0 : i32
    return %c0_i32, %c0_i32_0 : i32, i32
  }
  func.func @transform_7(%arg0: i32) -> (i32, i32) {
    %c0_i32 = arith.constant 0 : i32
    %c0_i32_0 = arith.constant 0 : i32
    return %arg0, %c0_i32 : i32, i32
  }
}

</mosaic_0001>

<bundles_post_ra>
// kernel: tpu_custom_call.1
= control target key start
LH: loop header
LB: loop body
LE: loop exit
PB: predicated region body
PF: predicated region fallthrough
CT: control target
= control target key end

     0   :  { %12 = vsyncpa [#allocation3], 0  ;;  %s457_s0 = inlined_call_operand.hbm [shape: bf16[8,16], index: 0, kind: input, shape index: {}]   ;;  %s458_s1 = inlined_call_operand.hbm [shape: bf16[16,32], index: 1, kind: input, shape index: {}]   ;;  %s459_s2 = inlined_call_operand.vmem [shape: f32[1,32], index: 2, kind: input, shape index: {}]   ;;  %s460_s3 = inlined_call_operand.hbm [shape: bf16[32,32], index: 3, kind: input, shape index: {}]   ;;  %s461_s4 = inlined_call_operand.vmem [shape: f32[1,32], index: 4, kind: input, shape index: {}]   ;;  %s462_s5 = inlined_call_operand.hbm [shape: bf16[32,128], index: 5, kind: input, shape index: {}]   ;;  %s463_s6 = inlined_call_operand.vmem [shape: f32[1,128], index: 6, kind: input, shape index: {}]   ;;  %s464_s7 = inlined_call_operand.hbm [shape: f32[8,128], index: 7, kind: output, shape index: {}]  }
   0x1   :  { %13 = vsyncpa [#allocation6], 0 }
   0x2   :  { %14 = vsyncpa [#allocation9], 0  ;;  %s31_s26 = sshll.u32 %s458_s1, 4  ;;  %s32_s26 = int_to_ptr.hbm [resolvable:$true] %s31_s26 }
   0x3   :  { %15 = vsyncpa [#allocation4], 0  ;;  %s386_s27 = smov [#allocation5]   ;;  %s21_s8 = sshll.u32 %s457_s0, 4  ;;  %s22_s8 = int_to_ptr.hbm [resolvable:$true] %s21_s8 }
   0x4   :  { %s33_s28 = sshll.u32 %s386_s27, 4  ;;  %s387_s9 = smov 64   ;;  %s34_s28 = int_to_ptr.vmem [resolvable:$true] %s33_s28 }
   0x5   :  { %s388_s10 = smov 4   ;;  %s389_s11 = smov [#allocation2]  }
   0x6   :  { %39 = dma.hbm_to_vmem [thread:$0]  %s32_s26, 128, %s34_s28, [#allocation6], %s387_s9, %s387_s9, %s388_s10  }
   0x7   :  { %s23_s12 = sshll.u32 %s389_s11, 4  ;;  %s46_s15 = sshll.u32 %s460_s3, 4  ;;  %s24_s12 = int_to_ptr.vmem [resolvable:$true] %s23_s12  ;;  %s47_s15 = int_to_ptr.hbm [resolvable:$true] %s46_s15 }
   0x8   :  { %26 = dma.hbm_to_vmem [thread:$0]  %s22_s8, 64, %s24_s12, [#allocation3]  }
   0x9   :  { %s61_s17 = sshll.u32 %s462_s5, 4  ;;  %s390_s18 = smov [#allocation7]   ;;  %s62_s17 = int_to_ptr.hbm [resolvable:$true] %s61_s17 }
   0xa   :  { %s48_s19 = sshll.u32 %s390_s18, 4  ;;  %s391_s0 = smov [#allocation8]   ;;  %s49_s19 = int_to_ptr.vmem [resolvable:$true] %s48_s19 }
   0xb   :  { %54 = dma.hbm_to_vmem [thread:$0]  %s47_s15, 256, %s49_s19, [#allocation6], %s387_s9, %s387_s9, %s388_s10  }
   0xc   :  { %s63_s20 = sshll.u32 %s391_s0, 4  ;;  %s64_s20 = int_to_ptr.vmem [resolvable:$true] %s63_s20 }
   0xd   :  { %69 = dma.hbm_to_vmem [thread:$0]  %s62_s17, 256, %s64_s20, [#allocation9], %s387_s9, %s387_s9, %s388_s10  }
   0xe   :  { %378 = dma.done.wait [#allocation3], 64  }
   0xf   :  { %379 = vsyncadd [#allocation3], 4294967232 }
  0x10   :  { %380 = dma.done.wait [#allocation6], 384  }
  0x11   :  { %381 = vsyncadd [#allocation6], 4294966912 }
  0x12   :  { %382 = dma.done.wait [#allocation9], 256  }
  0x13   :  { %383 = vsyncadd [#allocation9], 4294967040  ;;  %v239_v0 = vld [vmem:[#allocation5] sm:$0xff]  ;;  %v89_v1 = vld [vmem:[#allocation2] sm:$0xf]  ;;  %vm102_vm0 = vcmask 130048  }
  0x14   :  { %113 = vmatpush.bf16.msra.mxu0 %v239_v0  ;;  %v241_v2 = vld [vmem:[#allocation7 + $0x8] sm:$0xff]  ;;  %v240_v3 = vld [vmem:[#allocation7] sm:$0xff]  ;;  %v251_v4 = vld [vmem:[%s459_s2] ss:$0 sm:$0xff]  ;;  %vm141_vm1 = vcmask 261120   ;;  %s392_s24 = smov [#allocation10]  }
  0x15   :  { %151 = vmatpush.bf16.msra.mxu1 %v241_v2  ;;  %v243_v10 = vld [vmem:[#allocation8 + $0x8] sm:$0xff]  ;;  %v242_v11 = vld [vmem:[#allocation8] sm:$0xff]  ;;  %s202_s25 = sshll.u32 %s392_s24, 4  ;;  %s204_s28 = sshll.u32 %s464_s7, 4  ;;  %s203_s25 = int_to_ptr.vmem [resolvable:$true] %s202_s25  ;;  %s205_s28 = int_to_ptr.hbm [resolvable:$true] %s204_s28 }
  0x16   :  { %189 = vmatpush.bf16.msra.mxu2 %v243_v10  ;;  %v252_v12 = vld [vmem:[%s461_s4] ss:$0 sm:$0xff] }
  0x17   :  { %220 = vmatmul.msk.bf16.vlgmr.msra.gmra.mxu0 %vm102_vm0, %v89_v1  ;;  %v253_v18 = vld [vmem:[%s463_s6] ss:$0 sm:$0xff] }
  0x19   :  { %152 = vmatpush.bf16.msra.mxu1 %v240_v3 }
  0x1a   :  { %190 = vmatpush.bf16.msra.mxu2 %v242_v11 }
  0x94   :  { %v115_v5 = vpop.f32.mrf.mxu0 }
  0x95   :  { %v116_v6 = vadd.f32 %v251_v4, %v115_v5 }
  0x97   :  { %254 = vtanh.f32 %v116_v6 }
  0x9c   :  { %v117_v7 = vpop.f32.mrf.mxu0 }
  0x9d   :  { %v255_v8 = vpop.eup %254 }
  0x9e   :  { %v120_v9 = vpack.c.bf16 %v255_v8, %v255_v8 }
  0xa0   :  { %229 = vmatmul.msk.bf16.vlgmr.msra.gmra.mxu1 %vm141_vm1, %v120_v9 }
 0x11d   :  { %v154_v13 = vpop.f32.mrf.mxu1 }
 0x11e   :  { %v155_v14 = vadd.f32 %v252_v12, %v154_v13 }
 0x120   :  { %256 = vtanh.f32 %v155_v14 }
 0x125   :  { %v156_v15 = vpop.f32.mrf.mxu1 }
 0x126   :  { %v257_v16 = vpop.eup %256 }
 0x127   :  { %v159_v17 = vpack.c.bf16 %v257_v16, %v257_v16 }
 0x129   :  { %238 = vmatmul.msk.bf16.vlgmr.msra.gmra.mxu2 %vm141_vm1, %v159_v17 }
 0x1ac   :  { %v192_v19 = vpop.f32.mrf.mxu2 }
 0x1ad   :  { %v193_v20 = vadd.f32 %v253_v18, %v192_v19 }
 0x1af   :  { %196 = vst [vmem:[#allocation10] sm:$0xff] %v193_v20 }
 0x1b0   :  { %207 = dma.vmem_to_hbm [thread:$0]  %s203_s25, 128, %s205_s28, [#allocation4]  }
 0x1b4   :  { %v194_v21 = vpop.f32.mrf.mxu2 }
 0x1b5   :  { %384 = dma.done.wait [#allocation4], 128  }
 0x1b6   :  { %385 = vsyncadd [#allocation4], 4294967168 }
 0x1b7   :  { %212 = vsyncpa [#allocation3], 1 }
 0x1b8   :  { %213 = vsyncpa [#allocation6], 1 }
 0x1b9   :  { %214 = vsyncpa [#allocation9], 1 }
 0x1ba   :  { %215 = vsyncpa [#allocation4], 1 }

</bundles_post_ra>
